<compile_context>
chip_gen: v6e
topology: v6e:2x2x1
jax: 0.10.0
libtpu: 0.0.40
codegen_flags: <defaults>
</compile_context>

<pallas_src>
import functools

import jax
import jax.numpy as jnp
from jax.experimental import pallas as pl
from jax.experimental.pallas import tpu as pltpu


def _fused_encoder_kernel(p1_ref, w1_ref, w2_ref, b2_ref, mask_ref, o_ref, *, wo):
    # ---- layer 1: relu(W1_aug @ patches_T); bias folded via ones row ------
    act1 = jnp.dot(w1_ref[...], p1_ref[...], preferred_element_type=jnp.float32)
    act1 = jnp.maximum(act1, 0.0)                       # (C1, TM), lane-dense
    c1, tm = act1.shape

    # ---- layer 2: 3x3 stride-1 "same" conv on the on-chip activation ------
    pad = wo + 1                                        # max |flattened shift|
    zeros = jnp.zeros((c1, pad), jnp.float32)
    ext = jnp.concatenate([zeros, act1, zeros], axis=1)  # (C1, TM + 2*pad)

    taps = []
    t = 0
    for dy in (-1, 0, 1):
        for dx in (-1, 0, 1):
            s = dy * wo + dx                            # shift on flat pixels
            shifted = ext[:, pad + s:pad + s + tm]      # (C1, TM)
            m = mask_ref[pl.ds(t, 1), :]                # (1, TM) validity mask
            taps.append(shifted * m)
            t += 1
    stacked = jnp.concatenate(taps, axis=0)             # (9*C1, TM)

    acc = jnp.dot(w2_ref[...], stacked, preferred_element_type=jnp.float32)
    acc = acc + b2_ref[...]                             # (C2, TM) + (C2, 1)
    o_ref[...] = jnp.maximum(acc, 0.0).astype(o_ref.dtype)


def _im2col_T(x_nchw, kh, kw, stride, padding, ho, wo):
    """Transposed im2col: rows ordered (kh, kw, cin); cols = (n, y, x)."""
    n, c, _, _ = x_nchw.shape
    xp = jnp.pad(x_nchw, ((0, 0), (0, 0), (padding, padding), (padding, padding)))
    taps = []
    for i in range(kh):
        for j in range(kw):
            taps.append(xp[:, :, i:i + stride * (ho - 1) + 1:stride,
                               j:j + stride * (wo - 1) + 1:stride])
    pat = jnp.stack(taps, axis=0)                       # (KH*KW, N, C, Ho, Wo)
    pat = jnp.transpose(pat, (0, 2, 1, 3, 4))           # (KH*KW, C, N, Ho, Wo)
    return pat.reshape(kh * kw * c, n * ho * wo)


@jax.jit
def encoder_forward(x_nchw, params):
    """Forward of Encoder.  Input/output are NCHW float32, as in PyTorch."""
    w1, b1 = params["w1"], params["b1"]                 # (8,3,3,3), (8,)
    w2, b2 = params["w2"], params["b2"]                 # (3,8,3,3), (3,)
    n, cin, h, w = x_nchw.shape
    c1, _, kh, kw = w1.shape
    c2 = w2.shape[0]

    ho = (h + 2 * 1 - kh) // 2 + 1                      # layer-1: stride 2, pad 1
    wo = (w + 2 * 1 - kw) // 2 + 1                      # layer-2 keeps (ho, wo)
    hw = ho * wo
    m = n * hw

    # ---- tile the flattened pixel axis by whole images --------------------
    ipt = max(1, min(n, max(1, 1024 // hw)))            # images per tile
    while ipt < n and (ipt * hw) % 128 != 0:            # keep tiles lane-aligned
        ipt += 1
    n_pad = -(-n // ipt) * ipt
    tm = ipt * hw
    mp = n_pad * hw
    grid = (mp // tm,)

    # ---- layer-1 operands: lane-dense patches, bias folded, K padded ------
    kraw = kh * kw * cin                                # 27
    kpad = ((kraw + 1 + 7) // 8) * 8                    # 32
    pat = _im2col_T(x_nchw, kh, kw, 2, 1, ho, wo)       # (27, M)
    pat = jnp.concatenate([pat, jnp.ones((1, m), x_nchw.dtype)], axis=0)
    pat = jnp.pad(pat, ((0, kpad - (kraw + 1)), (0, mp - m)))

    w1_flat = jnp.transpose(w1, (0, 2, 3, 1)).reshape(c1, kraw)
    w1_aug = jnp.concatenate([w1_flat, b1.reshape(c1, 1)], axis=1)
    w1_aug = jnp.pad(w1_aug, ((0, 0), (0, kpad - (kraw + 1))))

    # ---- layer-2 operands --------------------------------------------------
    w2_flat = jnp.transpose(w2, (0, 2, 3, 1)).reshape(c2, 9 * c1)   # (3, 72)
    b2_col = b2.reshape(c2, 1)

    # per-tap validity masks for the in-kernel 3x3 gather (flattened layout)
    pos = jnp.arange(hw)
    ys, xs = pos // wo, pos % wo
    rows = []
    for dy in (-1, 0, 1):
        for dx in (-1, 0, 1):
            ok = (ys + dy >= 0) & (ys + dy < ho) & (xs + dx >= 0) & (xs + dx < wo)
            rows.append(ok)
    masks = jnp.tile(jnp.stack(rows, axis=0).astype(x_nchw.dtype), (1, n_pad))

    out2d = pl.pallas_call(
        functools.partial(_fused_encoder_kernel, wo=wo),
        out_shape=jax.ShapeDtypeStruct((c2, mp), x_nchw.dtype),
        grid=grid,
        in_specs=[
            pl.BlockSpec((kpad, tm), lambda i: (0, i)),      # layer-1 patches^T
            pl.BlockSpec((c1, kpad), lambda i: (0, 0)),      # W1 (+bias column)
            pl.BlockSpec((c2, 9 * c1), lambda i: (0, 0)),    # W2 taps
            pl.BlockSpec((c2, 1), lambda i: (0, 0)),         # b2
            pl.BlockSpec((9, tm), lambda i: (0, i)),         # tap masks
        ],
        out_specs=pl.BlockSpec((c2, tm), lambda i: (0, i)),
        compiler_params=pltpu.CompilerParams(dimension_semantics=("parallel",)),
    )(pat, w1_aug, w2_flat, b2_col, masks)

    y = out2d.reshape(c2, n_pad, ho, wo)                # (C2, n_pad, Ho, Wo)
    return jnp.transpose(y, (1, 0, 2, 3))[:n]           # NCHW


def _reference_forward(x_nchw, params):
    # Pure-JAX reference (lax conv) to check the Pallas path.
    def conv(x, w, b, stride):
        y = jax.lax.conv_general_dilated(
            x, w, window_strides=(stride, stride), padding=((1, 1), (1, 1)),
            dimension_numbers=("NCHW", "OIHW", "NCHW"))
        return jax.nn.relu(y + b.reshape(1, -1, 1, 1))
    x = conv(x_nchw, params["w1"], params["b1"], 2)
    x = conv(x, params["w2"], params["b2"], 1)
    return x


if __name__ == "__main__":
    key = jax.random.PRNGKey(0)
    kx, k1, k2, k3, k4 = jax.random.split(key, 5)
    # Deterministic synthetic parameters with the shapes from Encoder.__init__.
    params = {
        "w1": 0.1 * jax.random.normal(k1, (8, 3, 3, 3), jnp.float32),   # enc1 weight
        "b1": 0.05 * jax.random.normal(k2, (8,), jnp.float32),          # enc1 bias
        "w2": 0.1 * jax.random.normal(k3, (3, 8, 3, 3), jnp.float32),   # enc2 weight
        "b2": 0.05 * jax.random.normal(k4, (3,), jnp.float32),          # enc2 bias
    }
    x = jax.random.normal(kx, (2, 3, 16, 16), jnp.float32)  # NCHW

    out = jax.block_until_ready(encoder_forward(x, params))
    ref = jax.block_until_ready(_reference_forward(x, params))

    assert out.shape == (2, 3, 8, 8), out.shape
    err = float(jnp.max(jnp.abs(out - ref)))
    assert jnp.allclose(out, ref, atol=1e-4, rtol=1e-4), err
    print("KERNEL_OK")
</pallas_src>

<mosaic_0001>
module attributes {stable_mosaic.version = 11 : i64} {
  func.func @_fused_encoder_kernel(%arg0: i32, %arg1: memref<32x128xf32, #tpu.memory_space<vmem>>, %arg2: memref<8x32xf32, #tpu.memory_space<vmem>>, %arg3: memref<3x72xf32, #tpu.memory_space<vmem>>, %arg4: memref<3x1xf32, #tpu.memory_space<vmem>>, %arg5: memref<9x128xf32, #tpu.memory_space<vmem>>, %arg6: memref<3x128xf32, #tpu.memory_space<vmem>>) attributes {dimension_semantics = [#tpu.dimension_semantics<parallel>], iteration_bounds = array<i64: 1>, scalar_prefetch = 0 : i64, scratch_operands = 0 : i64, tpu.core_type = #tpu.core_type<tc>, window_params = [{transform_indices = @transform_0, window_bounds = array<i64: 32, 128>}, {pipeline_mode = #tpu.pipeline_mode<synchronous>, transform_indices = @transform_1, window_bounds = array<i64: 8, 32>}, {pipeline_mode = #tpu.pipeline_mode<synchronous>, transform_indices = @transform_2, window_bounds = array<i64: 3, 72>}, {pipeline_mode = #tpu.pipeline_mode<synchronous>, transform_indices = @transform_3, window_bounds = array<i64: 3, 1>}, {transform_indices = @transform_4, window_bounds = array<i64: 9, 128>}, {transform_indices = @transform_5, window_bounds = array<i64: 3, 128>}]} {
    %c0 = arith.constant 0 : index
    %c0_0 = arith.constant 0 : index
    %0 = vector.load %arg2[%c0, %c0_0] : memref<8x32xf32, #tpu.memory_space<vmem>>, vector<8x32xf32>
    %c0_1 = arith.constant 0 : index
    %c0_2 = arith.constant 0 : index
    %1 = vector.load %arg1[%c0_1, %c0_2] : memref<32x128xf32, #tpu.memory_space<vmem>>, vector<32x128xf32>
    %cst = arith.constant dense<0.000000e+00> : vector<8x128xf32>
    %2 = tpu.matmul %0, %1, %cst {dimension_numbers = #tpu.dot_dimension_numbers<[1], [0], [0], [1], [0, 0, 1, 1], [], []>} : vector<8x32xf32>, vector<32x128xf32>, vector<8x128xf32> -> vector<8x128xf32>
    %cst_3 = arith.constant 0.000000e+00 : f32
    %3 = vector.broadcast %cst_3 : f32 to vector<8x128xf32>
    %4 = arith.maximumf %2, %3 : vector<8x128xf32>
    %cst_4 = arith.constant 0.000000e+00 : f32
    %5 = vector.broadcast %cst_4 : f32 to vector<8x9xf32>
    %6 = tpu.concatenate %5, %4, %5 in 1 : vector<8x9xf32>, vector<8x128xf32>, vector<8x9xf32> -> vector<8x146xf32>
    %7 = vector.extract_strided_slice %6 {offsets = [0, 0], sizes = [8, 128], strides = [1, 1]} : vector<8x146xf32> to vector<8x128xf32>
    %c0_5 = arith.constant 0 : index
    %c0_6 = arith.constant 0 : index
    %8 = vector.load %arg5[%c0_5, %c0_6] : memref<9x128xf32, #tpu.memory_space<vmem>>, vector<1x128xf32>
    %9 = vector.broadcast %8 : vector<1x128xf32> to vector<8x128xf32>
    %10 = arith.mulf %7, %9 : vector<8x128xf32>
    %11 = vector.extract_strided_slice %6 {offsets = [0, 1], sizes = [8, 128], strides = [1, 1]} : vector<8x146xf32> to vector<8x128xf32>
    %c1 = arith.constant 1 : index
    %c0_7 = arith.constant 0 : index
    %12 = vector.load %arg5[%c1, %c0_7] : memref<9x128xf32, #tpu.memory_space<vmem>>, vector<1x128xf32>
    %13 = vector.broadcast %12 : vector<1x128xf32> to vector<8x128xf32>
    %14 = arith.mulf %11, %13 : vector<8x128xf32>
    %15 = vector.extract_strided_slice %6 {offsets = [0, 2], sizes = [8, 128], strides = [1, 1]} : vector<8x146xf32> to vector<8x128xf32>
    %c2 = arith.constant 2 : index
    %c0_8 = arith.constant 0 : index
    %16 = vector.load %arg5[%c2, %c0_8] : memref<9x128xf32, #tpu.memory_space<vmem>>, vector<1x128xf32>
    %17 = vector.broadcast %16 : vector<1x128xf32> to vector<8x128xf32>
    %18 = arith.mulf %15, %17 : vector<8x128xf32>
    %19 = vector.extract_strided_slice %6 {offsets = [0, 8], sizes = [8, 128], strides = [1, 1]} : vector<8x146xf32> to vector<8x128xf32>
    %c3 = arith.constant 3 : index
    %c0_9 = arith.constant 0 : index
    %20 = vector.load %arg5[%c3, %c0_9] : memref<9x128xf32, #tpu.memory_space<vmem>>, vector<1x128xf32>
    %21 = vector.broadcast %20 : vector<1x128xf32> to vector<8x128xf32>
    %22 = arith.mulf %19, %21 : vector<8x128xf32>
    %23 = vector.extract_strided_slice %6 {offsets = [0, 9], sizes = [8, 128], strides = [1, 1]} : vector<8x146xf32> to vector<8x128xf32>
    %c4 = arith.constant 4 : index
    %c0_10 = arith.constant 0 : index
    %24 = vector.load %arg5[%c4, %c0_10] : memref<9x128xf32, #tpu.memory_space<vmem>>, vector<1x128xf32>
    %25 = vector.broadcast %24 : vector<1x128xf32> to vector<8x128xf32>
    %26 = arith.mulf %23, %25 : vector<8x128xf32>
    %27 = vector.extract_strided_slice %6 {offsets = [0, 10], sizes = [8, 128], strides = [1, 1]} : vector<8x146xf32> to vector<8x128xf32>
    %c5 = arith.constant 5 : index
    %c0_11 = arith.constant 0 : index
    %28 = vector.load %arg5[%c5, %c0_11] : memref<9x128xf32, #tpu.memory_space<vmem>>, vector<1x128xf32>
    %29 = vector.broadcast %28 : vector<1x128xf32> to vector<8x128xf32>
    %30 = arith.mulf %27, %29 : vector<8x128xf32>
    %31 = vector.extract_strided_slice %6 {offsets = [0, 16], sizes = [8, 128], strides = [1, 1]} : vector<8x146xf32> to vector<8x128xf32>
    %c6 = arith.constant 6 : index
    %c0_12 = arith.constant 0 : index
    %32 = vector.load %arg5[%c6, %c0_12] : memref<9x128xf32, #tpu.memory_space<vmem>>, vector<1x128xf32>
    %33 = vector.broadcast %32 : vector<1x128xf32> to vector<8x128xf32>
    %34 = arith.mulf %31, %33 : vector<8x128xf32>
    %35 = vector.extract_strided_slice %6 {offsets = [0, 17], sizes = [8, 128], strides = [1, 1]} : vector<8x146xf32> to vector<8x128xf32>
    %c7 = arith.constant 7 : index
    %c0_13 = arith.constant 0 : index
    %36 = vector.load %arg5[%c7, %c0_13] : memref<9x128xf32, #tpu.memory_space<vmem>>, vector<1x128xf32>
    %37 = vector.broadcast %36 : vector<1x128xf32> to vector<8x128xf32>
    %38 = arith.mulf %35, %37 : vector<8x128xf32>
    %39 = vector.extract_strided_slice %6 {offsets = [0, 18], sizes = [8, 128], strides = [1, 1]} : vector<8x146xf32> to vector<8x128xf32>
    %c8 = arith.constant 8 : index
    %c0_14 = arith.constant 0 : index
    %40 = vector.load %arg5[%c8, %c0_14] : memref<9x128xf32, #tpu.memory_space<vmem>>, vector<1x128xf32>
    %41 = vector.broadcast %40 : vector<1x128xf32> to vector<8x128xf32>
    %42 = arith.mulf %39, %41 : vector<8x128xf32>
    %43 = tpu.concatenate %10, %14, %18, %22, %26, %30, %34, %38, %42 in 0 : vector<8x128xf32>, vector<8x128xf32>, vector<8x128xf32>, vector<8x128xf32>, vector<8x128xf32>, vector<8x128xf32>, vector<8x128xf32>, vector<8x128xf32>, vector<8x128xf32> -> vector<72x128xf32>
    %c0_15 = arith.constant 0 : index
    %c0_16 = arith.constant 0 : index
    %44 = vector.load %arg3[%c0_15, %c0_16] : memref<3x72xf32, #tpu.memory_space<vmem>>, vector<3x72xf32>
    %cst_17 = arith.constant dense<0.000000e+00> : vector<3x128xf32>
    %45 = tpu.matmul %44, %43, %cst_17 {dimension_numbers = #tpu.dot_dimension_numbers<[1], [0], [0], [1], [0, 0, 1, 1], [], []>} : vector<3x72xf32>, vector<72x128xf32>, vector<3x128xf32> -> vector<3x128xf32>
    %c0_18 = arith.constant 0 : index
    %c0_19 = arith.constant 0 : index
    %46 = vector.load %arg4[%c0_18, %c0_19] : memref<3x1xf32, #tpu.memory_space<vmem>>, vector<3x1xf32>
    %47 = vector.broadcast %46 : vector<3x1xf32> to vector<3x128xf32>
    %48 = arith.addf %45, %47 : vector<3x128xf32>
    %cst_20 = arith.constant 0.000000e+00 : f32
    %49 = vector.broadcast %cst_20 : f32 to vector<3x128xf32>
    %50 = arith.maximumf %48, %49 : vector<3x128xf32>
    %c0_21 = arith.constant 0 : index
    %c0_22 = arith.constant 0 : index
    %51 = vector.load %arg6[%c0_21, %c0_22] : memref<3x128xf32, #tpu.memory_space<vmem>>, vector<3x128xf32>
    tpu.vector_store %arg6[%c0_21, %c0_22], %50 {strides = array<i32>} : memref<3x128xf32, #tpu.memory_space<vmem>>, vector<3x128xf32>,
    return
  }
  func.func @transform_0(%arg0: i32) -> (i32, i32) {
    %c0_i32 = arith.constant 0 : i32
    %c0_i32_0 = arith.constant 0 : i32
    return %c0_i32, %arg0 : i32, i32
  }
  func.func @transform_1(%arg0: i32) -> (i32, i32) {
    %c0_i32 = arith.constant 0 : i32
    %c0_i32_0 = arith.constant 0 : i32
    %c0_i32_1 = arith.constant 0 : i32
    return %c0_i32, %c0_i32_0 : i32, i32
  }
  func.func @transform_2(%arg0: i32) -> (i32, i32) {
    %c0_i32 = arith.constant 0 : i32
    %c0_i32_0 = arith.constant 0 : i32
    %c0_i32_1 = arith.constant 0 : i32
    return %c0_i32, %c0_i32_0 : i32, i32
  }
  func.func @transform_3(%arg0: i32) -> (i32, i32) {
    %c0_i32 = arith.constant 0 : i32
    %c0_i32_0 = arith.constant 0 : i32
    %c0_i32_1 = arith.constant 0 : i32
    return %c0_i32, %c0_i32_0 : i32, i32
  }
  func.func @transform_4(%arg0: i32) -> (i32, i32) {
    %c0_i32 = arith.constant 0 : i32
    %c0_i32_0 = arith.constant 0 : i32
    return %c0_i32, %arg0 : i32, i32
  }
  func.func @transform_5(%arg0: i32) -> (i32, i32) {
    %c0_i32 = arith.constant 0 : i32
    %c0_i32_0 = arith.constant 0 : i32
    return %c0_i32, %arg0 : i32, i32
  }
}

</mosaic_0001>

<bundles_post_ra>
// kernel: tile.9
= control target key start
LH: loop header
LB: loop body
LE: loop exit
PB: predicated region body
PF: predicated region fallthrough
CT: control target
= control target key end

     0   :  { %vm48_vm0 = vcmask 1047556   ;;  %vm50_vm1 = vcmask 523264   ;;  %vm65_vm2 = vcmask 1048064   ;;  %s142_s0 = inlined_call_operand.vmem [shape: f32[9,2,64], index: 0, kind: input, shape index: {}]   ;;  %s143_s1 = inlined_call_operand.vmem [shape: f32[9,128], index: 1, kind: output, shape index: {}]  }
   0x1   :  { %v82_v0 = vld [vmem:[%s142_s0 + $0xe] sm:$0x3]  ;;  %v83_v1 = vld [vmem:[%s142_s0 + $0xc] sm:$0x3]  ;;  %v84_v2 = vld [vmem:[%s142_s0 + $0xa] sm:$0x3] }
   0x2   :  { %14 = vst [vmem:[#allocation0 + $0x38] sm:$0x3] %v82_v0  ;;  %19 = vst [vmem:[#allocation0 + $0x30] sm:$0x3] %v83_v1  ;;  %v85_v3 = vld [vmem:[%s142_s0 + $0x8] sm:$0x3] }
   0x3   :  { %24 = vst [vmem:[#allocation0 + $0x28] sm:$0x3] %v84_v2  ;;  %v86_v4 = vld [vmem:[%s142_s0 + $0x6] sm:$0x3]  ;;  %v87_v5 = vld [vmem:[%s142_s0 + $0x4] sm:$0x3] }
   0x4   :  { %29 = vst [vmem:[#allocation0 + $0x20] sm:$0x3] %v85_v3  ;;  %34 = vst [vmem:[#allocation0 + $0x18] sm:$0x3] %v86_v4  ;;  %v88_v6 = vld [vmem:[%s142_s0 + $0x2] sm:$0x3] }
   0x5   :  { %39 = vst [vmem:[#allocation0 + $0x10] sm:$0x3] %v87_v5  ;;  %v44_v7 = vld [vmem:[%s142_s0] sm:$0x3]  ;;  %43 = vst [vmem:[#allocation0 + $0x8] sm:$0x3] %v88_v6 }
   0x6   :  { %45 = vst [vmem:[#allocation0] sm:$0x3] %v44_v7  ;;  %v81_v8 = vld [vmem:[%s142_s0 + $0x10] sm:$0x3]  ;;  %s92_s0 = smov 64  }
   0x7   :  { %9 = vst [vmem:[#allocation0 + $0x40] sm:$0x3] %v81_v8 }
   0xb   :  { %v60_v9 = vld [vmem:[#allocation0 + $0x1] ss:$8 sm:$0xf0]   ;;  %v47_v10 = vld [vmem:[#allocation0] ss:$8 sm:$0xf0]  }
   0xd   :  { %v46_v11 = vld [vmem:[#allocation0] ss:$8 sm:$0xf]   ;;  %v58_v12 = vld [vmem:[#allocation0 + $0x1] ss:$8 sm:$0xf]  }
   0xe   :  { %v62_v13 = vsel %vm48_vm0, %v60_v9, %v58_v12  ;;  %v49_v14 = vsel %vm48_vm0, %v47_v10, %v46_v11  ;;  %v53_v15 = vld [vmem:[#allocation0 + $0x40] sm:$0x1]   ;;  %v68_v16 = vld [vmem:[#allocation0 + $0x41] sm:$0x1]  }
   0xf   :  { %63 = vrot.lane.b32.xlu0 %v62_v13, %s92_s0  ;;  %51 = vst.msk [vmem:[%s143_s1] sm:$0xff] %vm50_vm1, %v49_v14   ;;  %89 = vst.msk [vmem:[%s143_s1 + $0x8] sm:$0x1] %vm50_vm1, %v53_v15  }
  0x13   :  { %69 = vrot.lane.b32.xlu0 %v68_v16, %s92_s0 }
  0x81   :  { %v64_v17 = vpop.permute.xlu0 %63  }
  0x82   :  { %66 = vst.msk [vmem:[%s143_s1] sm:$0xff] %vm65_vm2, %v64_v17  }
  0x85   :  { %v70_v18 = vpop.permute.xlu0 %69  }
  0x86   :  { %90 = vst.msk [vmem:[%s143_s1 + $0x8] sm:$0x1] %vm65_vm2, %v70_v18  }

// kernel: encoder_forward.1
= control target key start
LH: loop header
LB: loop body
LE: loop exit
PB: predicated region body
PF: predicated region fallthrough
CT: control target
= control target key end

     0   :  { %v439_v0 = vmov 0.0   ;;  %vm440_vm0 = vmmov 0   ;;  %s441_s26 = smov 17   ;;  %vm25_vm1 = vcmask 261120   ;;  %s442_s8 = smov 16   ;;  %vm104_vm2 = vcmask 72704   ;;  %s565_s0 = inlined_call_operand.vmem [shape: f32[32,128], index: 0, kind: input, shape index: {}]   ;;  %s566_s4 = inlined_call_operand.vmem [shape: f32[9,128], index: 4, kind: input, shape index: {}]   ;;  %s567_s1 = inlined_call_operand.vmem [shape: f32[8,32], index: 1, kind: input, shape index: {}]   ;;  %s568_s3 = inlined_call_operand.vmem [shape: f32[3,1], index: 3, kind: input, shape index: {}]   ;;  %s569_s2 = inlined_call_operand.vmem [shape: f32[3,72], index: 2, kind: input, shape index: {}]   ;;  %s570_s5 = inlined_call_operand.vmem [shape: f32[3,128], index: 5, kind: output, shape index: {}]  }
   0x1   :  { %386 = vmatprep.subr.mxu0 %v439_v0  ;;  %v24_v1 = vld [vmem:[%s565_s0 + $0x18] sm:$0xff]  ;;  %v23_v2 = vld [vmem:[%s565_s0 + $0x10] sm:$0xff]  ;;  %394 = vmatprep.mubr.msk.f32.mxu0 %vm440_vm0, %v439_v0  ;;  %v368_v3 = vld [vmem:[%s566_s4 + $0x7] ss:$0 sm:$0xff]  ;;  %s443_s11 = smov 9   ;;  %s444_s13 = smov 2  }
   0x2   :  { %387 = vmatpush3.msra.mxu0 %v24_v1  ;;  %397 = vmatprep.subr.mxu1 %v439_v0  ;;  %v22_v4 = vld [vmem:[%s565_s0 + $0x8] sm:$0xff]  ;;  %v367_v5 = vld [vmem:[%s566_s4 + $0x6] ss:$0 sm:$0xff]  ;;  %v365_v8 = vld [vmem:[%s566_s4 + $0x4] ss:$0 sm:$0xff]  ;;  %s445_s15 = smov 18  }
   0x3   :  { %388 = vmatprep.subr.mxu0 %v439_v0  ;;  %185 = vrot.lane.b32.xlu1 %v368_v3, %s441_s26  ;;  %v21_v6 = vld [vmem:[%s565_s0] sm:$0xff]  ;;  %v369_v13 = vld [vmem:[%s566_s4 + $0x8] ss:$0 sm:$0xff]  ;;  %s446_s18 = smov 10   ;;  %s447_s21 = smov 8   ;;  %v455_v39 = vmov 0  }
   0x4   :  { %389 = vmatpush3.msra.mxu0 %v23_v2  ;;  %415 = vmatprep.mubr.msk.f32.mxu1 %vm440_vm0, %v439_v0  ;;  %v20_v7 = vld [vmem:[%s567_s1] sm:$0xff]  ;;  %s448_s24 = smov 1   ;;  %s449_s25 = smov 110   ;;  %vm270_vm3 = vcmask 900096   ;;  %vm261_vm4 = vcmask 908288   ;;  %vm252_vm5 = vcmask 916480  }
   0x5   :  { %390 = vmatprep.subr.mxu0 %v439_v0  ;;  %v363_v9 = vld [vmem:[%s566_s4 + $0x2] ss:$0 sm:$0xff]  ;;  %v366_v14 = vld [vmem:[%s566_s4 + $0x5] ss:$0 sm:$0xff]  ;;  %v364_v15 = vld [vmem:[%s566_s4 + $0x3] ss:$0 sm:$0xff]  ;;  %437 = vset.pattern.permute.xlu1 %v455_v39 }
   0x6   :  { %391 = vmatpush3.msra.mxu0 %v22_v4  ;;  %v362_v16 = vld [vmem:[%s566_s4 + $0x1] ss:$0 sm:$0xff]  ;;  %s450_s26 = smov 111   ;;  %s451_s27 = smov 112   ;;  %438 = vset.pattern.permute.xlu0 %v455_v39  ;;  %vm243_vm6 = vcmask 965632   ;;  %vm234_vm7 = vcmask 973824  }
   0x7   :  { %392 = vmatprep.subr.mxu0 %v439_v0  ;;  %174 = vrot.lane.b32.xlu1 %v367_v5, %s442_s8  ;;  %s452_s28 = smov 118   ;;  %s453_s29 = smov 119   ;;  %v274_v45 = vld [vmem:[%s568_s3] sm:$0x7]  ;;  %vm225_vm8 = vcmask 982016   ;;  %vm216_vm9 = vcmask 1031168  }
   0x8   :  { %393 = vmatpush3.msra.mxu0 %v21_v6  ;;  %s454_s30 = smov 120   ;;  %s456_s6 = smov 126   ;;  %vm207_vm10 = vcmask 1039360   ;;  %v361_v4 = vld [vmem:[%s566_s4] ss:$0 sm:$0xff]  ;;  %vm280_vm11 = vcmask 588800  }
   0x9   :  { %395 = vmatmul.mubr.msk.f32.vlgmr.msra.gmra.mxu0 %vm25_vm1, %v20_v7  ;;  %s457_s7 = smov 127  }
   0xb   :  { %152 = vrot.lane.b32.xlu1 %v365_v8, %s443_s11 }
   0xf   :  { %130 = vrot.lane.b32.xlu1 %v363_v9, %s444_s13  ;;  %v273_v9 = vld [vmem:[%s569_s2] sm:$0x7] }
  0x75   :  { %v186_v23 = vpop.permute.xlu1 %185 }
  0x79   :  { %v175_v26 = vpop.permute.xlu1 %174 }
  0x7d   :  { %v153_v32 = vpop.permute.xlu1 %152 }
  0x81   :  { %v131_v38 = vpop.permute.xlu1 %130 }
  0xc9   :  { %v95_v10 = vpop.f32.mrf.mxu0 }
  0xca   :  { %v99_v11 = vmax.f32 %v95_v10, 0.0 }
  0xcb   :  { %v396_v12 = vpop.f32.mrf.mxu0 }
  0xcc   :  { %101 = vrot.lane.b32.xlu0 %v99_v11, %s443_s11 }
  0xd0   :  { %196 = vrot.lane.b32.xlu0 %v369_v13, %s445_s15 }
  0xd4   :  { %163 = vrot.lane.b32.xlu0 %v366_v14, %s446_s18 }
  0xd8   :  { %141 = vrot.lane.b32.xlu0 %v364_v15, %s447_s21 }
  0xdc   :  { %119 = vrot.lane.b32.xlu0 %v362_v16, %s448_s24 }
 0x13e   :  { %v102_v17 = vpop.permute.xlu0 %101 }
 0x13f   :  { %v534_v18 = vsel %vm104_vm2, 0.0, %v102_v17  ;;  %v106_v19 = vsel %vm104_vm2, %v102_v17, 0.0 }
 0x140   :  { %v189_v24 = vmul.f32 %v186_v23, %v106_v19  ;;  %v188_v25 = vmul.f32 %v186_v23, %v534_v18  ;;  %v178_v27 = vmul.f32 %v175_v26, %v106_v19  ;;  %v177_v28 = vmul.f32 %v175_v26, %v534_v18 }
 0x141   :  { %v156_v33 = vmul.f32 %v153_v32, %v106_v19  ;;  %v155_v34 = vmul.f32 %v153_v32, %v534_v18  ;;  %v133_v40 = vmul.f32 %v131_v38, %v534_v18  ;;  %v134_v41 = vmul.f32 %v131_v38, %v106_v19 }
 0x142   :  { %v197_v20 = vpop.permute.xlu0 %196  ;;  %v112_v8 = vmul.f32 %v361_v4, %v534_v18 }
 0x143   :  { %v199_v21 = vmul.f32 %v197_v20, %v534_v18  ;;  %v200_v22 = vmul.f32 %v197_v20, %v106_v19 }
 0x145   :  { %268 = vrot.lane.b32.xlu0 %v200_v22, %s449_s25  ;;  %266 = vrot.lane.b32.xlu1 %v199_v21, %s449_s25 }
 0x146   :  { %v164_v29 = vpop.permute.xlu0 %163 }
 0x147   :  { %v166_v30 = vmul.f32 %v164_v29, %v534_v18  ;;  %v167_v31 = vmul.f32 %v164_v29, %v106_v19 }
 0x149   :  { %259 = vrot.lane.b32.xlu0 %v189_v24, %s450_s26  ;;  %257 = vrot.lane.b32.xlu1 %v188_v25, %s450_s26 }
 0x14a   :  { %v142_v35 = vpop.permute.xlu0 %141 }
 0x14b   :  { %v144_v36 = vmul.f32 %v142_v35, %v534_v18  ;;  %v145_v37 = vmul.f32 %v142_v35, %v106_v19 }
 0x14d   :  { %250 = vrot.lane.b32.xlu0 %v178_v27, %s451_s27  ;;  %248 = vrot.lane.b32.xlu1 %v177_v28, %s451_s27 }
 0x14e   :  { %v120_v42 = vpop.permute.xlu0 %119 }
 0x14f   :  { %v122_v43 = vmul.f32 %v120_v42, %v534_v18  ;;  %v123_v44 = vmul.f32 %v120_v42, %v106_v19 }
 0x151   :  { %241 = vrot.lane.b32.xlu0 %v167_v31, %s452_s28  ;;  %239 = vrot.lane.b32.xlu1 %v166_v30, %s452_s28 }
 0x155   :  { %232 = vrot.lane.b32.xlu0 %v156_v33, %s453_s29  ;;  %230 = vrot.lane.b32.xlu1 %v155_v34, %s453_s29 }
 0x159   :  { %223 = vrot.lane.b32.xlu0 %v145_v37, %s454_s30  ;;  %221 = vrot.lane.b32.xlu1 %v144_v36, %s454_s30 }
 0x15d   :  { %214 = vrot.lane.b32.xlu0 %v134_v41, %s456_s6  ;;  %212 = vrot.lane.b32.xlu1 %v133_v40, %s456_s6 }
 0x161   :  { %205 = vrot.lane.b32.xlu0 %v123_v44, %s457_s7  ;;  %203 = vrot.lane.b32.xlu1 %v122_v43, %s457_s7 }
 0x165   :  { %277 = vperm.xlu1 %437, %v274_v45  }
 0x1b7   :  { %v267_v46 = vpop.permute.xlu1 %266  ;;  %v269_v47 = vpop.permute.xlu0 %268 }
 0x1b8   :  { %v271_v48 = vsel %vm270_vm3, %v267_v46, %v269_v47 }
 0x1b9   :  { %398 = vmatpush3.msra.mxu1 %v271_v48 }
 0x1ba   :  { %399 = vmatprep.subr.mxu1 %v439_v0 }
 0x1bb   :  { %v258_v49 = vpop.permute.xlu1 %257  ;;  %v260_v50 = vpop.permute.xlu0 %259 }
 0x1bc   :  { %v262_v51 = vsel %vm261_vm4, %v258_v49, %v260_v50 }
 0x1bd   :  { %400 = vmatpush3.msra.mxu1 %v262_v51 }
 0x1be   :  { %401 = vmatprep.subr.mxu1 %v439_v0 }
 0x1bf   :  { %v249_v52 = vpop.permute.xlu1 %248  ;;  %v251_v53 = vpop.permute.xlu0 %250 }
 0x1c0   :  { %v253_v54 = vsel %vm252_vm5, %v249_v52, %v251_v53 }
 0x1c1   :  { %402 = vmatpush3.msra.mxu1 %v253_v54 }
 0x1c2   :  { %403 = vmatprep.subr.mxu1 %v439_v0 }
 0x1c3   :  { %v240_v55 = vpop.permute.xlu1 %239  ;;  %v242_v56 = vpop.permute.xlu0 %241 }
 0x1c4   :  { %v244_v57 = vsel %vm243_vm6, %v240_v55, %v242_v56 }
 0x1c5   :  { %404 = vmatpush3.msra.mxu1 %v244_v57 }
 0x1c6   :  { %405 = vmatprep.subr.mxu1 %v439_v0 }
 0x1c7   :  { %v231_v58 = vpop.permute.xlu1 %230  ;;  %v233_v59 = vpop.permute.xlu0 %232 }
 0x1c8   :  { %v235_v60 = vsel %vm234_vm7, %v231_v58, %v233_v59 }
 0x1c9   :  { %406 = vmatpush3.msra.mxu1 %v235_v60 }
 0x1ca   :  { %407 = vmatprep.subr.mxu1 %v439_v0 }
 0x1cb   :  { %v222_v61 = vpop.permute.xlu1 %221  ;;  %v224_v62 = vpop.permute.xlu0 %223 }
 0x1cc   :  { %v226_v63 = vsel %vm225_vm8, %v222_v61, %v224_v62 }
 0x1cd   :  { %408 = vmatpush3.msra.mxu1 %v226_v63 }
 0x1ce   :  { %409 = vmatprep.subr.mxu1 %v439_v0 }
 0x1cf   :  { %v213_v1 = vpop.permute.xlu1 %212  ;;  %v215_v2 = vpop.permute.xlu0 %214 }
 0x1d0   :  { %v217_v3 = vsel %vm216_vm9, %v213_v1, %v215_v2 }
 0x1d1   :  { %410 = vmatpush3.msra.mxu1 %v217_v3 }
 0x1d2   :  { %411 = vmatprep.subr.mxu1 %v439_v0 }
 0x1d3   :  { %v204_v5 = vpop.permute.xlu1 %203  ;;  %v206_v6 = vpop.permute.xlu0 %205 }
 0x1d4   :  { %v208_v7 = vsel %vm207_vm10, %v204_v5, %v206_v6 }
 0x1d5   :  { %412 = vmatpush3.msra.mxu1 %v208_v7 }
 0x1d6   :  { %413 = vmatprep.subr.mxu1 %v439_v0 }
 0x1d7   :  { %414 = vmatpush3.msra.mxu1 %v112_v8 }
 0x1d8   :  { %416 = vmatmul.mubr.msk.f32.vlgmr.msra.gmra.mxu1 %vm280_vm11, %v273_v9 }
 0x1e0   :  { %v278_v10 = vpop.permute.xlu1 %277 }
 0x298   :  { %v350_v11 = vpop.f32.mrf.mxu1 }
 0x299   :  { %v351_v12 = vadd.f32 %v350_v11, %v278_v10 }
 0x29a   :  { %v417_v13 = vpop.f32.mrf.mxu1 }
 0x29b   :  { %v354_v14 = vmax.f32 %v351_v12, 0.0 }
 0x29d   :  { %355 = vst [vmem:[%s570_s5] sm:$0x7] %v354_v14 }

</bundles_post_ra>
